<compile_context>
chip_gen: v5e
topology: v5e:2x2
jax: 0.10.0
libtpu: 0.0.40
codegen_flags: <defaults>
</compile_context>

<pallas_src>
import jax
import jax.numpy as jnp
from jax import lax
from jax.experimental import pallas as pl
from jax.experimental.pallas import tpu as pltpu


_LANE = 128
_SUBLANE = 8


def _round_up(x, m):
    return (x + m - 1) // m * m


def _pad_axis(a, axis, target):
    pad = target - a.shape[axis]
    if pad == 0:
        return a
    widths = [(0, 0)] * a.ndim
    widths[axis] = (0, pad)
    return jnp.pad(a, widths)


# ----------------------------------------------------------------------------
# Pallas kernel: fused [Linear -> ReLU] * L  ->  predict layer (lane-dense out)
# ----------------------------------------------------------------------------
def _mlp_kernel(*refs):
    # refs layout (inputs..., out):
    #   eu (TB,E) bf16 | ei (TB,E) bf16 | W0u (E,H0) bf16 | W0i (E,H0) bf16
    #   b0 (1,H0) f32  | [Wi (H_{i-1},H_i) bf16, bi (1,H_i) f32] * (L-1)
    #   wp (1,H_last) bf16 | bp (1,) f32 in SMEM | out (1,TB) f32
    eu_ref, ei_ref, w0u_ref, w0i_ref, b0_ref = refs[:5]
    wp_ref, bp_ref, out_ref = refs[-3], refs[-2], refs[-1]
    hidden_refs = refs[5:-3]

    # First hidden layer: split-weight matmuls replace concat(eu, ei) @ W0.
    # bf16 MXU inputs, f32 accumulation + bias + ReLU, then one cast to bf16.
    x_f32 = (jnp.dot(eu_ref[...], w0u_ref[...], preferred_element_type=jnp.float32)
             + jnp.dot(ei_ref[...], w0i_ref[...], preferred_element_type=jnp.float32)
             + b0_ref[...])
    x = jnp.maximum(x_f32, 0.0).astype(jnp.bfloat16)

    # Remaining hidden layers: activations stay bf16 between layers.
    for j in range(0, len(hidden_refs), 2):
        w_ref, b_ref = hidden_refs[j], hidden_refs[j + 1]
        x_f32 = jnp.dot(x, w_ref[...], preferred_element_type=jnp.float32) + b_ref[...]
        x = jnp.maximum(x_f32, 0.0).astype(jnp.bfloat16)

    # Predict layer: contract the last dim of both operands so no transpose of
    # x is materialized; result (1, TB) puts batch on the lane axis -> full,
    # unmasked lane-dense store.
    pred = lax.dot_general(
        wp_ref[...], x,
        dimension_numbers=(((1,), (1,)), ((), ())),
        preferred_element_type=jnp.float32)
    out_ref[...] = pred + bp_ref[0]


# ----------------------------------------------------------------------------
# One-time parameter preparation (run OUTSIDE jit / outside the per-call path):
# split W0, pad feature dims to 128 lanes, cast MXU operands to bf16.
# Zero padding is mathematically exact (padded cols give ReLU(0)=0 and padded
# w_pred entries are 0).
# ----------------------------------------------------------------------------
def prepare_params(raw_params):
    embed_user, embed_item, hidden_ws, hidden_bs, w_pred, b_pred = raw_params
    h_pad = [_round_up(w.shape[1], _LANE) for w in hidden_ws]

    e = hidden_ws[0].shape[0] // 2
    w0 = _pad_axis(hidden_ws[0], 1, h_pad[0])
    w0u = w0[:e].astype(jnp.bfloat16)
    w0i = w0[e:].astype(jnp.bfloat16)
    b0 = _pad_axis(hidden_bs[0], 0, h_pad[0]).reshape(1, -1).astype(jnp.float32)

    deep = []
    for i in range(1, len(hidden_ws)):
        w = _pad_axis(_pad_axis(hidden_ws[i], 0, h_pad[i - 1]), 1, h_pad[i])
        b = _pad_axis(hidden_bs[i], 0, h_pad[i]).reshape(1, -1).astype(jnp.float32)
        deep.append((w.astype(jnp.bfloat16), b))

    wp_row = _pad_axis(w_pred[:, 0], 0, h_pad[-1]).reshape(1, -1).astype(jnp.bfloat16)
    bp = b_pred.reshape(1).astype(jnp.float32)
    return (embed_user.astype(jnp.bfloat16), embed_item.astype(jnp.bfloat16),
            w0u, w0i, b0, tuple(deep), wp_row, bp)


# ----------------------------------------------------------------------------
# VMEM budget estimate (bytes) for CompilerParams — sized from actual buffers.
# ----------------------------------------------------------------------------
def _vmem_limit_bytes(eu, weight_arrays, tb, h_dims):
    wbytes = sum(int(a.size) * a.dtype.itemsize for a in weight_arrays)
    in_bytes = 2 * 2 * tb * eu.shape[1] * eu.dtype.itemsize     # eu+ei, 2x buffered
    out_bytes = 2 * tb * 4                                      # (1,TB) f32, 2x buffered
    act_bytes = tb * max(h_dims) * 6                            # f32 + bf16 live activation
    est = 2 * wbytes + in_bytes + out_bytes + 2 * act_bytes
    return int(min(64 << 20, max(16 << 20, 2 * est + (4 << 20))))


# ----------------------------------------------------------------------------
# pallas_call wrapper: batch-tiled grid, resident weights, lane-dense output.
# ----------------------------------------------------------------------------
def mlp_pallas_forward(eu, ei, weights, *, block_b=1024):
    w0u, w0i, b0, deep, wp_row, bp = weights
    B, E = eu.shape

    # Batch tile: ALWAYS a multiple of 128 lanes (output block is (1, TB)).
    # When B <= block_b, split into >=2 tiles so both v7x TensorCores get work.
    block_b = max(_LANE, _round_up(block_b, _LANE))
    TB = min(block_b, max(_LANE, _round_up((B + 1) // 2, _LANE)))
    B_pad = _round_up(B, TB)
    if B_pad != B:
        eu = _pad_axis(eu, 0, B_pad)
        ei = _pad_axis(ei, 0, B_pad)
    num_tiles = B_pad // TB

    def resident(shape):  # weight/bias stays in VMEM across all grid steps
        nd = len(shape)
        return pl.BlockSpec(shape, lambda i, _nd=nd: (0,) * _nd)

    args = [eu, ei, w0u, w0i, b0]
    in_specs = [
        pl.BlockSpec((TB, E), lambda i: (i, 0)),   # eu tile
        pl.BlockSpec((TB, E), lambda i: (i, 0)),   # ei tile
        resident(w0u.shape), resident(w0i.shape), resident(b0.shape),
    ]
    for w, b in deep:
        args += [w, b]
        in_specs += [resident(w.shape), resident(b.shape)]
    args += [wp_row, bp]
    in_specs += [resident(wp_row.shape),
                 pl.BlockSpec(memory_space=pltpu.MemorySpace.SMEM)]  # b_pred scalar

    weight_arrays = [w0u, w0i, b0, wp_row] + [t for pair in deep for t in pair]
    h_dims = [b0.shape[1]] + [b.shape[1] for _, b in deep]
    vmem_limit = _vmem_limit_bytes(eu, weight_arrays, TB, h_dims)

    out = pl.pallas_call(
        _mlp_kernel,
        grid=(num_tiles,),
        in_specs=in_specs,
        out_specs=pl.BlockSpec((1, TB), lambda i: (0, i)),        # lane-dense
        out_shape=jax.ShapeDtypeStruct((1, B_pad), jnp.float32),
        compiler_params=pltpu.CompilerParams(
            dimension_semantics=("parallel",),        # shard batch over TCs
            vmem_limit_bytes=vmem_limit),
    )(*args)
    return out.reshape(-1)[:B]                       # matches prediction.view(-1)


# ----------------------------------------------------------------------------
# Parameter init (mirrors the PyTorch __init__ init scheme, deterministic)
# ----------------------------------------------------------------------------
def init_params(key, user_num, item_num, embedding_dim, hidden_layer):
    keys = jax.random.split(key, 3 + len(hidden_layer))

    # nn.init.normal_(std=0.01)
    embed_user = 0.01 * jax.random.normal(
        keys[0], (user_num, embedding_dim), jnp.float32)
    embed_item = 0.01 * jax.random.normal(
        keys[1], (item_num, embedding_dim), jnp.float32)

    hidden_ws, hidden_bs = [], []
    in_dim = embedding_dim * 2
    for i, h in enumerate(hidden_layer):
        # xavier_uniform_: U(-a, a), a = sqrt(6 / (fan_in + fan_out))
        bound = (6.0 / (in_dim + h)) ** 0.5
        w = jax.random.uniform(keys[2 + i], (in_dim, h), jnp.float32,
                               minval=-bound, maxval=bound)
        hidden_ws.append(w)
        hidden_bs.append(jnp.zeros((h,), jnp.float32))
        in_dim = h

    # kaiming_uniform_(a=1, nonlinearity='sigmoid'): gain=1, fan_in mode.
    fan_in = hidden_layer[-1]
    bound = (3.0 / fan_in) ** 0.5
    w_pred = jax.random.uniform(keys[-1], (fan_in, 1), jnp.float32,
                                minval=-bound, maxval=bound)
    b_pred = jnp.zeros((1,), jnp.float32)
    return embed_user, embed_item, hidden_ws, hidden_bs, w_pred, b_pred


# ----------------------------------------------------------------------------
# Full forward: embedding gather (plain JAX glue) + fused Pallas MLP.
# `params` must be the output of prepare_params (prepared once at init).
# ----------------------------------------------------------------------------
def mlp_forward(user_ids, item_ids, params, *, block_b=1024):
    embed_user, embed_item = params[0], params[1]
    weights = params[2:]
    eu = jnp.take(embed_user, user_ids, axis=0)   # (B, E) bf16
    ei = jnp.take(embed_item, item_ids, axis=0)   # (B, E) bf16
    return mlp_pallas_forward(eu, ei, weights, block_b=block_b)


if __name__ == "__main__":
    # Small, module-consistent shapes.
    user_num, item_num = 16, 16
    embedding_dim = 32
    hidden_layer = [64, 32]
    batch = 8

    key = jax.random.PRNGKey(0)
    pkey, ukey, ikey = jax.random.split(key, 3)

    raw_params = init_params(pkey, user_num, item_num, embedding_dim, hidden_layer)
    params = prepare_params(raw_params)           # one-time prep, outside jit

    user = jax.random.randint(ukey, (batch,), 0, user_num, dtype=jnp.int32)
    item = jax.random.randint(ikey, (batch,), 0, item_num, dtype=jnp.int32)

    fwd = jax.jit(mlp_forward)
    pred = fwd(user, item, params)
    jax.block_until_ready(pred)

    # Pure-JAX f32 reference (same bf16-quantized embedding tables, f32 math).
    embed_user_f32, embed_item_f32, hidden_ws, hidden_bs, w_pred, b_pred = raw_params
    eu_q = embed_user_f32.astype(jnp.bfloat16).astype(jnp.float32)
    ei_q = embed_item_f32.astype(jnp.bfloat16).astype(jnp.float32)
    x = jnp.concatenate(
        [jnp.take(eu_q, user, axis=0), jnp.take(ei_q, item, axis=0)], axis=-1)
    for w, b in zip(hidden_ws, hidden_bs):
        x = jnp.maximum(x @ w + b, 0.0)
    ref = (x @ w_pred + b_pred).reshape(-1)

    assert pred.shape == (batch,)
    err = float(jnp.max(jnp.abs(pred - ref)))
    # bf16 MXU operands vs f32 reference -> loose tolerance (values are ~1e-2).
    assert err < 2e-3, f"max abs diff {err}"
    print("KERNEL_OK")
</pallas_src>

<mosaic_0001>
module attributes {stable_mosaic.version = 11 : i64} {
  func.func @_mlp_kernel(%arg0: i32, %arg1: memref<128x32xbf16, #tpu.memory_space<vmem>>, %arg2: memref<128x32xbf16, #tpu.memory_space<vmem>>, %arg3: memref<32x128xbf16, #tpu.memory_space<vmem>>, %arg4: memref<32x128xbf16, #tpu.memory_space<vmem>>, %arg5: memref<1x128xf32, #tpu.memory_space<vmem>>, %arg6: memref<128x128xbf16, #tpu.memory_space<vmem>>, %arg7: memref<1x128xf32, #tpu.memory_space<vmem>>, %arg8: memref<1x128xbf16, #tpu.memory_space<vmem>>, %arg9: memref<1xf32, #tpu.memory_space<smem>>, %arg10: memref<1x128xf32, #tpu.memory_space<vmem>>) attributes {dimension_semantics = [#tpu.dimension_semantics<parallel>], iteration_bounds = array<i64: 1>, scalar_prefetch = 0 : i64, scratch_operands = 0 : i64, tpu.core_type = #tpu.core_type<tc>, window_params = [{transform_indices = @transform_0, window_bounds = array<i64: 128, 32>}, {transform_indices = @transform_1, window_bounds = array<i64: 128, 32>}, {pipeline_mode = #tpu.pipeline_mode<synchronous>, transform_indices = @transform_2, window_bounds = array<i64: 32, 128>}, {pipeline_mode = #tpu.pipeline_mode<synchronous>, transform_indices = @transform_3, window_bounds = array<i64: 32, 128>}, {pipeline_mode = #tpu.pipeline_mode<synchronous>, transform_indices = @transform_4, window_bounds = array<i64: 1, 128>}, {pipeline_mode = #tpu.pipeline_mode<synchronous>, transform_indices = @transform_5, window_bounds = array<i64: 128, 128>}, {pipeline_mode = #tpu.pipeline_mode<synchronous>, transform_indices = @transform_6, window_bounds = array<i64: 1, 128>}, {pipeline_mode = #tpu.pipeline_mode<synchronous>, transform_indices = @transform_7, window_bounds = array<i64: 1, 128>}, {transform_indices = @transform_8, window_bounds = array<i64: 1>}, {transform_indices = @transform_9, window_bounds = array<i64: 1, 128>}]} {
    %c0 = arith.constant 0 : index
    %c0_0 = arith.constant 0 : index
    %0 = vector.load %arg1[%c0, %c0_0] : memref<128x32xbf16, #tpu.memory_space<vmem>>, vector<128x32xbf16>
    %c0_1 = arith.constant 0 : index
    %c0_2 = arith.constant 0 : index
    %1 = vector.load %arg3[%c0_1, %c0_2] : memref<32x128xbf16, #tpu.memory_space<vmem>>, vector<32x128xbf16>
    %cst = arith.constant dense<0.000000e+00> : vector<128x128xf32>
    %2 = tpu.matmul %0, %1, %cst {dimension_numbers = #tpu.dot_dimension_numbers<[1], [0], [0], [1], [0, 0, 1, 1], [], []>} : vector<128x32xbf16>, vector<32x128xbf16>, vector<128x128xf32> -> vector<128x128xf32>
    %c0_3 = arith.constant 0 : index
    %c0_4 = arith.constant 0 : index
    %3 = vector.load %arg2[%c0_3, %c0_4] : memref<128x32xbf16, #tpu.memory_space<vmem>>, vector<128x32xbf16>
    %c0_5 = arith.constant 0 : index
    %c0_6 = arith.constant 0 : index
    %4 = vector.load %arg4[%c0_5, %c0_6] : memref<32x128xbf16, #tpu.memory_space<vmem>>, vector<32x128xbf16>
    %cst_7 = arith.constant dense<0.000000e+00> : vector<128x128xf32>
    %5 = tpu.matmul %3, %4, %cst_7 {dimension_numbers = #tpu.dot_dimension_numbers<[1], [0], [0], [1], [0, 0, 1, 1], [], []>} : vector<128x32xbf16>, vector<32x128xbf16>, vector<128x128xf32> -> vector<128x128xf32>
    %6 = arith.addf %2, %5 : vector<128x128xf32>
    %c0_8 = arith.constant 0 : index
    %c0_9 = arith.constant 0 : index
    %7 = vector.load %arg5[%c0_8, %c0_9] : memref<1x128xf32, #tpu.memory_space<vmem>>, vector<1x128xf32>
    %8 = vector.broadcast %7 : vector<1x128xf32> to vector<128x128xf32>
    %9 = arith.addf %6, %8 : vector<128x128xf32>
    %cst_10 = arith.constant 0.000000e+00 : f32
    %10 = vector.broadcast %cst_10 : f32 to vector<128x128xf32>
    %11 = arith.maximumf %9, %10 : vector<128x128xf32>
    %12 = arith.truncf %11 : vector<128x128xf32> to vector<128x128xbf16>
    %c0_11 = arith.constant 0 : index
    %c0_12 = arith.constant 0 : index
    %13 = vector.load %arg6[%c0_11, %c0_12] : memref<128x128xbf16, #tpu.memory_space<vmem>>, vector<128x128xbf16>
    %cst_13 = arith.constant dense<0.000000e+00> : vector<128x128xf32>
    %14 = tpu.matmul %12, %13, %cst_13 {dimension_numbers = #tpu.dot_dimension_numbers<[1], [0], [0], [1], [0, 0, 1, 1], [], []>} : vector<128x128xbf16>, vector<128x128xbf16>, vector<128x128xf32> -> vector<128x128xf32>
    %c0_14 = arith.constant 0 : index
    %c0_15 = arith.constant 0 : index
    %15 = vector.load %arg7[%c0_14, %c0_15] : memref<1x128xf32, #tpu.memory_space<vmem>>, vector<1x128xf32>
    %16 = vector.broadcast %15 : vector<1x128xf32> to vector<128x128xf32>
    %17 = arith.addf %14, %16 : vector<128x128xf32>
    %cst_16 = arith.constant 0.000000e+00 : f32
    %18 = vector.broadcast %cst_16 : f32 to vector<128x128xf32>
    %19 = arith.maximumf %17, %18 : vector<128x128xf32>
    %20 = arith.truncf %19 : vector<128x128xf32> to vector<128x128xbf16>
    %c0_17 = arith.constant 0 : index
    %c0_18 = arith.constant 0 : index
    %21 = vector.load %arg8[%c0_17, %c0_18] : memref<1x128xbf16, #tpu.memory_space<vmem>>, vector<1x128xbf16>
    %cst_19 = arith.constant dense<0.000000e+00> : vector<1x128xf32>
    %22 = tpu.matmul %21, %20, %cst_19 {dimension_numbers = #tpu.dot_dimension_numbers<[1], [1], [0], [0], [0, 0, 1, 0], [], []>} : vector<1x128xbf16>, vector<128x128xbf16>, vector<1x128xf32> -> vector<1x128xf32>
    %c0_20 = arith.constant 0 : index
    %23 = memref.load %arg9[%c0_20] : memref<1xf32, #tpu.memory_space<smem>>
    %24 = vector.broadcast %23 : f32 to vector<1x128xf32>
    %25 = arith.addf %22, %24 : vector<1x128xf32>
    %c0_21 = arith.constant 0 : index
    %c0_22 = arith.constant 0 : index
    %26 = vector.load %arg10[%c0_21, %c0_22] : memref<1x128xf32, #tpu.memory_space<vmem>>, vector<1x128xf32>
    tpu.vector_store %arg10[%c0_21, %c0_22], %25 {strides = array<i32>} : memref<1x128xf32, #tpu.memory_space<vmem>>, vector<1x128xf32>,
    return
  }
  func.func @transform_0(%arg0: i32) -> (i32, i32) {
    %c0_i32 = arith.constant 0 : i32
    %c0_i32_0 = arith.constant 0 : i32
    return %arg0, %c0_i32 : i32, i32
  }
  func.func @transform_1(%arg0: i32) -> (i32, i32) {
    %c0_i32 = arith.constant 0 : i32
    %c0_i32_0 = arith.constant 0 : i32
    return %arg0, %c0_i32 : i32, i32
  }
  func.func @transform_2(%arg0: i32) -> (i32, i32) {
    %c0_i32 = arith.constant 0 : i32
    %c0_i32_0 = arith.constant 0 : i32
    %c0_i32_1 = arith.constant 0 : i32
    return %c0_i32, %c0_i32_0 : i32, i32
  }
  func.func @transform_3(%arg0: i32) -> (i32, i32) {
    %c0_i32 = arith.constant 0 : i32
    %c0_i32_0 = arith.constant 0 : i32
    %c0_i32_1 = arith.constant 0 : i32
    return %c0_i32, %c0_i32_0 : i32, i32
  }
  func.func @transform_4(%arg0: i32) -> (i32, i32) {
    %c0_i32 = arith.constant 0 : i32
    %c0_i32_0 = arith.constant 0 : i32
    %c0_i32_1 = arith.constant 0 : i32
    return %c0_i32, %c0_i32_0 : i32, i32
  }
  func.func @transform_5(%arg0: i32) -> (i32, i32) {
    %c0_i32 = arith.constant 0 : i32
    %c0_i32_0 = arith.constant 0 : i32
    %c0_i32_1 = arith.constant 0 : i32
    return %c0_i32, %c0_i32_0 : i32, i32
  }
  func.func @transform_6(%arg0: i32) -> (i32, i32) {
    %c0_i32 = arith.constant 0 : i32
    %c0_i32_0 = arith.constant 0 : i32
    %c0_i32_1 = arith.constant 0 : i32
    return %c0_i32, %c0_i32_0 : i32, i32
  }
  func.func @transform_7(%arg0: i32) -> (i32, i32) {
    %c0_i32 = arith.constant 0 : i32
    %c0_i32_0 = arith.constant 0 : i32
    %c0_i32_1 = arith.constant 0 : i32
    return %c0_i32, %c0_i32_0 : i32, i32
  }
  func.func @transform_8(%arg0: i32) -> i32 {
    %c0_i32 = arith.constant 0 : i32
    %c0_i32_0 = arith.constant 0 : i32
    return %c0_i32 : i32
  }
  func.func @transform_9(%arg0: i32) -> (i32, i32) {
    %c0_i32 = arith.constant 0 : i32
    %c0_i32_0 = arith.constant 0 : i32
    return %c0_i32, %arg0 : i32, i32
  }
}

</mosaic_0001>

<bundles_post_ra>
// kernel: mlp_forward.1
= control target key start
LH: loop header
LB: loop body
LE: loop exit
PB: predicated region body
PF: predicated region fallthrough
CT: control target
= control target key end

     0   :  { %vm126_vm0 = vcmask 261120   ;;  %s872_s3 = inlined_call_operand.vmem [shape: bf16[32,128], index: 3, kind: input, shape index: {}]   ;;  %s873_s2 = inlined_call_operand.vmem [shape: bf16[32,128], index: 2, kind: input, shape index: {}]   ;;  %s874_s1 = inlined_call_operand.vmem [shape: bf16[128,32], index: 1, kind: input, shape index: {}]   ;;  %s875_s0 = inlined_call_operand.vmem [shape: bf16[128,32], index: 0, kind: input, shape index: {}]   ;;  %s876_s4 = inlined_call_operand.vmem [shape: f32[1,128], index: 4, kind: input, shape index: {}]   ;;  %s877_s5 = inlined_call_operand.vmem [shape: bf16[128,128], index: 5, kind: input, shape index: {}]   ;;  %s878_s6 = inlined_call_operand.vmem [shape: f32[1,128], index: 6, kind: input, shape index: {}]   ;;  %s879_s7 = inlined_call_operand.vmem [shape: bf16[1,128], index: 7, kind: input, shape index: {}]   ;;  %s880_s8 = inlined_call_operand.<no memory space> [shape: f32[1], index: 8, kind: input, shape index: {}]   ;;  %s881_s9 = inlined_call_operand.vmem [shape: f32[1,128], index: 9, kind: output, shape index: {}]  }
   0x1   :  { %v678_v0 = vld [vmem:[%s872_s3 + $0x8] sm:$0xff]  ;;  %v677_v2 = vld [vmem:[%s872_s3] sm:$0xff]  ;;  %v671_v8 = vld [vmem:[%s874_s1 + $0x10] sm:$0xff] }
   0x2   :  { %v668_v1 = vld [vmem:[%s873_s2 + $0x8] sm:$0xff]  ;;  %157 = vmatpush.bf16.msra.mxu0 %v678_v0  ;;  %v667_v3 = vld [vmem:[%s873_s2] sm:$0xff]  ;;  %v661_v9 = vld [vmem:[%s875_s0 + $0x10] sm:$0xff] }
   0x3   :  { %282 = vmatpush.bf16.msra.mxu1 %v668_v1  ;;  %v669_v4 = vld [vmem:[%s874_s1] sm:$0xff]  ;;  %v670_v6 = vld [vmem:[%s874_s1 + $0x8] sm:$0xff]  ;;  %v672_v10 = vld [vmem:[%s874_s1 + $0x18] sm:$0xff] }
   0x4   :  { %v659_v5 = vld [vmem:[%s875_s0] sm:$0xff]  ;;  %v660_v7 = vld [vmem:[%s875_s0 + $0x8] sm:$0xff]  ;;  %v662_v11 = vld [vmem:[%s875_s0 + $0x18] sm:$0xff] }
   0x5   :  { %v673_v12 = vld [vmem:[%s874_s1 + $0x20] sm:$0xff]  ;;  %v686_v14 = vld [vmem:[%s877_s5 + $0x38] sm:$0xff]  ;;  %v674_v15 = vld [vmem:[%s874_s1 + $0x28] sm:$0xff] }
   0x6   :  { %158 = vmatpush.bf16.msra.mxu0 %v677_v2  ;;  %v663_v13 = vld [vmem:[%s875_s0 + $0x20] sm:$0xff]  ;;  %437 = vmatpush.bf16.msra.mxu2 %v686_v14  ;;  %v664_v16 = vld [vmem:[%s875_s0 + $0x28] sm:$0xff]  ;;  %v685_v17 = vld [vmem:[%s877_s5 + $0x30] sm:$0xff] }
   0x7   :  { %283 = vmatpush.bf16.msra.mxu1 %v667_v3  ;;  %v684_v18 = vld [vmem:[%s877_s5 + $0x28] sm:$0xff]  ;;  %v683_v19 = vld [vmem:[%s877_s5 + $0x20] sm:$0xff]  ;;  %v675_v20 = vld [vmem:[%s874_s1 + $0x30] sm:$0xff] }
   0x8   :  { %v665_v21 = vld [vmem:[%s875_s0 + $0x30] sm:$0xff]  ;;  %v682_v22 = vld [vmem:[%s877_s5 + $0x18] sm:$0xff]  ;;  %v680_v24 = vld [vmem:[%s877_s5 + $0x8] sm:$0xff] }
   0x9   :  { %571 = vmatmul.msk.bf16.vlgmr.msra.gmra.mxu0 %vm126_vm0, %v669_v4  ;;  %v681_v23 = vld [vmem:[%s877_s5 + $0x10] sm:$0xff]  ;;  %v679_v25 = vld [vmem:[%s877_s5] sm:$0xff]  ;;  %v676_v26 = vld [vmem:[%s874_s1 + $0x38] sm:$0xff] }
   0xa   :  { %619 = vmatmul.msk.bf16.vlgmr.msra.gmra.mxu1 %vm126_vm0, %v659_v5  ;;  %438 = vmatpush.bf16.msra.mxu2 %v685_v17  ;;  %v666_v27 = vld [vmem:[%s875_s0 + $0x38] sm:$0xff]  ;;  %v842_v31 = vld [vmem:[%s876_s4] ss:$0 sm:$0xff] }
   0xe   :  { %439 = vmatpush.bf16.msra.mxu2 %v684_v18 }
  0x12   :  { %440 = vmatpush.bf16.msra.mxu2 %v683_v19 }
  0x16   :  { %441 = vmatpush.bf16.msra.mxu2 %v682_v22 }
  0x19   :  { %572 = vmatmul.msk.bf16.gmra.mxu0 %vm126_vm0, %v670_v6 }
  0x1a   :  { %620 = vmatmul.msk.bf16.gmra.mxu1 %vm126_vm0, %v660_v7  ;;  %442 = vmatpush.bf16.msra.mxu2 %v681_v23 }
  0x1e   :  { %443 = vmatpush.bf16.msra.mxu2 %v680_v24 }
  0x22   :  { %444 = vmatpush.bf16.msra.mxu2 %v679_v25 }
  0x29   :  { %573 = vmatmul.msk.bf16.gmra.mxu0 %vm126_vm0, %v671_v8 }
  0x2a   :  { %621 = vmatmul.msk.bf16.gmra.mxu1 %vm126_vm0, %v661_v9 }
  0x39   :  { %574 = vmatmul.msk.bf16.gmra.mxu0 %vm126_vm0, %v672_v10 }
  0x3a   :  { %622 = vmatmul.msk.bf16.gmra.mxu1 %vm126_vm0, %v662_v11 }
  0x49   :  { %575 = vmatmul.msk.bf16.gmra.mxu0 %vm126_vm0, %v673_v12 }
  0x4a   :  { %623 = vmatmul.msk.bf16.gmra.mxu1 %vm126_vm0, %v663_v13 }
  0x59   :  { %576 = vmatmul.msk.bf16.gmra.mxu0 %vm126_vm0, %v674_v15 }
  0x5a   :  { %624 = vmatmul.msk.bf16.gmra.mxu1 %vm126_vm0, %v664_v16 }
  0x69   :  { %577 = vmatmul.msk.bf16.gmra.mxu0 %vm126_vm0, %v675_v20 }
  0x6a   :  { %625 = vmatmul.msk.bf16.gmra.mxu1 %vm126_vm0, %v665_v21 }
  0x79   :  { %578 = vmatmul.msk.bf16.gmra.mxu0 %vm126_vm0, %v676_v26 }
  0x7a   :  { %626 = vmatmul.msk.bf16.gmra.mxu1 %vm126_vm0, %v666_v27 }
  0x86   :  { %v160_v28 = vpop.f32.mrf.mxu0 }
  0x87   :  { %v285_v29 = vpop.f32.mrf.mxu1 }
  0x88   :  { %v286_v30 = vadd.f32 %v285_v29, %v160_v28 }
  0x8a   :  { %v329_v34 = vadd.f32 %v842_v31, %v286_v30 }
  0x8c   :  { %v345_v37 = vmax.f32 %v329_v34, 0.0 }
  0x8e   :  { %v162_v32 = vpop.f32.mrf.mxu0 }
  0x8f   :  { %v287_v33 = vpop.f32.mrf.mxu1 }
  0x90   :  { %v288_v35 = vadd.f32 %v287_v33, %v162_v32 }
  0x92   :  { %v330_v36 = vadd.f32 %v842_v31, %v288_v35 }
  0x94   :  { %v346_v38 = vmax.f32 %v330_v36, 0.0 }
  0x96   :  { %v361_v39 = vpack.c.bf16 %v346_v38, %v345_v37  ;;  %v165_v40 = vpop.f32.mrf.mxu0 }
  0x97   :  { %v290_v41 = vpop.f32.mrf.mxu1 }
  0x98   :  { %445 = vmatmul.bf16.vlgmr.msra.gmra.mxu2 %v361_v39  ;;  %v291_v42 = vadd.f32 %v290_v41, %v165_v40 }
  0x9a   :  { %v331_v45 = vadd.f32 %v842_v31, %v291_v42 }
  0x9c   :  { %v347_v48 = vmax.f32 %v331_v45, 0.0 }
  0x9e   :  { %v167_v43 = vpop.f32.mrf.mxu0 }
  0x9f   :  { %v292_v44 = vpop.f32.mrf.mxu1 }
  0xa0   :  { %v293_v46 = vadd.f32 %v292_v44, %v167_v43 }
  0xa2   :  { %v332_v47 = vadd.f32 %v842_v31, %v293_v46 }
  0xa4   :  { %v348_v49 = vmax.f32 %v332_v47, 0.0 }
  0xa6   :  { %v362_v50 = vpack.c.bf16 %v348_v49, %v347_v48  ;;  %v170_v51 = vpop.f32.mrf.mxu0 }
  0xa7   :  { %v295_v52 = vpop.f32.mrf.mxu1 }
  0xa8   :  { %450 = vmatmul.bf16.gmra.mxu2 %v362_v50  ;;  %v296_v53 = vadd.f32 %v295_v52, %v170_v51 }
  0xaa   :  { %v333_v56 = vadd.f32 %v842_v31, %v296_v53 }
  0xac   :  { %v349_v59 = vmax.f32 %v333_v56, 0.0 }
  0xae   :  { %v172_v54 = vpop.f32.mrf.mxu0 }
  0xaf   :  { %v297_v55 = vpop.f32.mrf.mxu1 }
  0xb0   :  { %v298_v57 = vadd.f32 %v297_v55, %v172_v54  ;;  %v688_v55 = vld [vmem:[%s878_s6] ss:$0 sm:$0xff] }
  0xb2   :  { %v334_v58 = vadd.f32 %v842_v31, %v298_v57 }
  0xb4   :  { %v350_v60 = vmax.f32 %v334_v58, 0.0 }
  0xb6   :  { %v363_v61 = vpack.c.bf16 %v350_v60, %v349_v59  ;;  %v175_v62 = vpop.f32.mrf.mxu0 }
  0xb7   :  { %v300_v63 = vpop.f32.mrf.mxu1 }
  0xb8   :  { %455 = vmatmul.bf16.gmra.mxu2 %v363_v61  ;;  %v301_v0 = vadd.f32 %v300_v63, %v175_v62 }
  0xba   :  { %v335_v3 = vadd.f32 %v842_v31, %v301_v0 }
  0xbc   :  { %v351_v6 = vmax.f32 %v335_v3, 0.0 }
  0xbe   :  { %v177_v1 = vpop.f32.mrf.mxu0 }
  0xbf   :  { %v302_v2 = vpop.f32.mrf.mxu1 }
  0xc0   :  { %v303_v4 = vadd.f32 %v302_v2, %v177_v1 }
  0xc2   :  { %v336_v5 = vadd.f32 %v842_v31, %v303_v4 }
  0xc4   :  { %v352_v7 = vmax.f32 %v336_v5, 0.0 }
  0xc6   :  { %v364_v8 = vpack.c.bf16 %v352_v7, %v351_v6  ;;  %v180_v9 = vpop.f32.mrf.mxu0 }
  0xc7   :  { %v305_v10 = vpop.f32.mrf.mxu1 }
  0xc8   :  { %460 = vmatmul.bf16.gmra.mxu2 %v364_v8  ;;  %v306_v11 = vadd.f32 %v305_v10, %v180_v9 }
  0xca   :  { %v337_v14 = vadd.f32 %v842_v31, %v306_v11 }
  0xcc   :  { %v353_v17 = vmax.f32 %v337_v14, 0.0 }
  0xce   :  { %v182_v12 = vpop.f32.mrf.mxu0 }
  0xcf   :  { %v307_v13 = vpop.f32.mrf.mxu1 }
  0xd0   :  { %v308_v15 = vadd.f32 %v307_v13, %v182_v12 }
  0xd2   :  { %v338_v16 = vadd.f32 %v842_v31, %v308_v15 }
  0xd4   :  { %v354_v18 = vmax.f32 %v338_v16, 0.0 }
  0xd6   :  { %v365_v19 = vpack.c.bf16 %v354_v18, %v353_v17  ;;  %v185_v20 = vpop.f32.mrf.mxu0 }
  0xd7   :  { %v310_v21 = vpop.f32.mrf.mxu1 }
  0xd8   :  { %465 = vmatmul.bf16.gmra.mxu2 %v365_v19  ;;  %v311_v22 = vadd.f32 %v310_v21, %v185_v20 }
  0xda   :  { %v339_v25 = vadd.f32 %v842_v31, %v311_v22 }
  0xdc   :  { %v355_v28 = vmax.f32 %v339_v25, 0.0 }
  0xde   :  { %v187_v23 = vpop.f32.mrf.mxu0 }
  0xdf   :  { %v312_v24 = vpop.f32.mrf.mxu1 }
  0xe0   :  { %v313_v26 = vadd.f32 %v312_v24, %v187_v23 }
  0xe2   :  { %v340_v27 = vadd.f32 %v842_v31, %v313_v26 }
  0xe4   :  { %v356_v29 = vmax.f32 %v340_v27, 0.0 }
  0xe6   :  { %v366_v30 = vpack.c.bf16 %v356_v29, %v355_v28  ;;  %v190_v32 = vpop.f32.mrf.mxu0 }
  0xe7   :  { %v315_v33 = vpop.f32.mrf.mxu1 }
  0xe8   :  { %470 = vmatmul.bf16.gmra.mxu2 %v366_v30  ;;  %v316_v34 = vadd.f32 %v315_v33, %v190_v32 }
  0xea   :  { %v341_v37 = vadd.f32 %v842_v31, %v316_v34 }
  0xec   :  { %v357_v40 = vmax.f32 %v341_v37, 0.0 }
  0xee   :  { %v192_v35 = vpop.f32.mrf.mxu0 }
  0xef   :  { %v317_v36 = vpop.f32.mrf.mxu1 }
  0xf0   :  { %v318_v38 = vadd.f32 %v317_v36, %v192_v35 }
  0xf2   :  { %v342_v39 = vadd.f32 %v842_v31, %v318_v38 }
  0xf4   :  { %v358_v41 = vmax.f32 %v342_v39, 0.0 }
  0xf6   :  { %v367_v42 = vpack.c.bf16 %v358_v41, %v357_v40  ;;  %v195_v43 = vpop.f32.mrf.mxu0 }
  0xf7   :  { %v320_v44 = vpop.f32.mrf.mxu1 }
  0xf8   :  { %475 = vmatmul.bf16.gmra.mxu2 %v367_v42  ;;  %v321_v45 = vadd.f32 %v320_v44, %v195_v43 }
  0xfa   :  { %v343_v48 = vadd.f32 %v842_v31, %v321_v45 }
  0xfc   :  { %v359_v51 = vmax.f32 %v343_v48, 0.0  ;;  %v512_v48 = vstv %s880_s8 }
  0xfe   :  { %v197_v46 = vpop.f32.mrf.mxu0 }
  0xff   :  { %v322_v47 = vpop.f32.mrf.mxu1 }
 0x100   :  { %v323_v49 = vadd.f32 %v322_v47, %v197_v46  ;;  %v510_v47 = vld [vmem:[%s879_s7] sm:$0x1] }
 0x102   :  { %v344_v50 = vadd.f32 %v842_v31, %v323_v49 }
 0x104   :  { %v360_v52 = vmax.f32 %v344_v50, 0.0 }
 0x106   :  { %v368_v53 = vpack.c.bf16 %v360_v52, %v359_v51 }
 0x108   :  { %480 = vmatmul.bf16.gmra.mxu2 %v368_v53 }
 0x11b   :  { %v446_v54 = vpop.f32.mrf.mxu2 }
 0x11c   :  { %v447_v56 = vadd.f32 %v688_v55, %v446_v54 }
 0x11e   :  { %v486_v59 = vmax.f32 %v447_v56, 0.0 }
 0x123   :  { %v448_v57 = vpop.f32.mrf.mxu2 }
 0x124   :  { %v449_v58 = vadd.f32 %v688_v55, %v448_v57 }
 0x126   :  { %v487_v60 = vmax.f32 %v449_v58, 0.0 }
 0x128   :  { %v502_v61 = vpack.c.bf16 %v487_v60, %v486_v59 }
 0x12b   :  { %v451_v62 = vpop.f32.mrf.mxu2 }
 0x12c   :  { %v452_v63 = vadd.f32 %v688_v55, %v451_v62 }
 0x12e   :  { %v488_v31 = vmax.f32 %v452_v63, 0.0 }
 0x133   :  { %v453_v0 = vpop.f32.mrf.mxu2 }
 0x134   :  { %v454_v1 = vadd.f32 %v688_v55, %v453_v0 }
 0x136   :  { %v489_v2 = vmax.f32 %v454_v1, 0.0 }
 0x138   :  { %v503_v3 = vpack.c.bf16 %v489_v2, %v488_v31 }
 0x13b   :  { %v456_v4 = vpop.f32.mrf.mxu2 }
 0x13c   :  { %v457_v5 = vadd.f32 %v688_v55, %v456_v4 }
 0x13e   :  { %v490_v8 = vmax.f32 %v457_v5, 0.0 }
 0x143   :  { %v458_v6 = vpop.f32.mrf.mxu2 }
 0x144   :  { %v459_v7 = vadd.f32 %v688_v55, %v458_v6 }
 0x146   :  { %v491_v9 = vmax.f32 %v459_v7, 0.0 }
 0x148   :  { %v504_v10 = vpack.c.bf16 %v491_v9, %v490_v8 }
 0x14b   :  { %v461_v11 = vpop.f32.mrf.mxu2 }
 0x14c   :  { %v462_v12 = vadd.f32 %v688_v55, %v461_v11 }
 0x14e   :  { %v492_v15 = vmax.f32 %v462_v12, 0.0 }
 0x153   :  { %v463_v13 = vpop.f32.mrf.mxu2 }
 0x154   :  { %v464_v14 = vadd.f32 %v688_v55, %v463_v13 }
 0x156   :  { %v493_v16 = vmax.f32 %v464_v14, 0.0 }
 0x158   :  { %v505_v17 = vpack.c.bf16 %v493_v16, %v492_v15 }
 0x15b   :  { %v466_v18 = vpop.f32.mrf.mxu2 }
 0x15c   :  { %v467_v19 = vadd.f32 %v688_v55, %v466_v18 }
 0x15e   :  { %v494_v22 = vmax.f32 %v467_v19, 0.0 }
 0x163   :  { %v468_v20 = vpop.f32.mrf.mxu2 }
 0x164   :  { %v469_v21 = vadd.f32 %v688_v55, %v468_v20 }
 0x166   :  { %v495_v23 = vmax.f32 %v469_v21, 0.0 }
 0x168   :  { %v506_v24 = vpack.c.bf16 %v495_v23, %v494_v22 }
 0x16b   :  { %v471_v25 = vpop.f32.mrf.mxu2 }
 0x16c   :  { %v472_v43 = vadd.f32 %v688_v55, %v471_v25 }
 0x16e   :  { %v496_v45 = vmax.f32 %v472_v43, 0.0 }
 0x173   :  { %v473_v26 = vpop.f32.mrf.mxu2 }
 0x174   :  { %v474_v41 = vadd.f32 %v688_v55, %v473_v26 }
 0x176   :  { %v497_v44 = vmax.f32 %v474_v41, 0.0 }
 0x178   :  { %v507_v46 = vpack.c.bf16 %v497_v44, %v496_v45 }
 0x17b   :  { %v476_v27 = vpop.f32.mrf.mxu2 }
 0x17c   :  { %v477_v38 = vadd.f32 %v688_v55, %v476_v27 }
 0x17e   :  { %v498_v40 = vmax.f32 %v477_v38, 0.0 }
 0x183   :  { %v478_v28 = vpop.f32.mrf.mxu2 }
 0x184   :  { %v479_v36 = vadd.f32 %v688_v55, %v478_v28 }
 0x186   :  { %v499_v39 = vmax.f32 %v479_v36, 0.0 }
 0x188   :  { %v508_v42 = vpack.c.bf16 %v499_v39, %v498_v40 }
 0x18b   :  { %v481_v29 = vpop.f32.mrf.mxu2 }
 0x18c   :  { %v482_v30 = vadd.f32 %v688_v55, %v481_v29 }
 0x18e   :  { %v500_v34 = vmax.f32 %v482_v30, 0.0 }
 0x193   :  { %v483_v32 = vpop.f32.mrf.mxu2 }
 0x194   :  { %v484_v33 = vadd.f32 %v688_v55, %v483_v32 }
 0x196   :  { %v501_v35 = vmax.f32 %v484_v33, 0.0 }
 0x198   :  { %v509_v37 = vpack.c.bf16 %v501_v35, %v500_v34 }
 0x19a   :  { %513 = vmatpush.bf16.xpose.msra.mxu3 %v509_v37 }
 0x1a2   :  { %514 = vmatpush.bf16.xpose.msra.mxu3 %v508_v42 }
 0x1aa   :  { %515 = vmatpush.bf16.xpose.msra.mxu3 %v507_v46 }
 0x1b2   :  { %516 = vmatpush.bf16.xpose.msra.mxu3 %v506_v24 }
 0x1ba   :  { %517 = vmatpush.bf16.xpose.msra.mxu3 %v505_v17 }
 0x1c2   :  { %518 = vmatpush.bf16.xpose.msra.mxu3 %v504_v10 }
 0x1ca   :  { %519 = vmatpush.bf16.xpose.msra.mxu3 %v503_v3 }
 0x1d2   :  { %520 = vmatpush.bf16.xpose.msra.mxu3 %v502_v61 }
 0x1d9   :  { %521 = vmatmul.bf16.vlgmr.msra.gmra.mxu3 %v510_v47 }
 0x25c   :  { %v522_v49 = vpop.f32.mrf.mxu3 }
 0x25d   :  { %v523_v50 = vadd.f32 %v522_v49, %v512_v48 }
 0x25f   :  { %526 = vst [vmem:[%s881_s9] sm:$0x1] %v523_v50 }
 0x264   :  { %v524_v51 = vpop.f32.mrf.mxu3 }

</bundles_post_ra>
